<compile_context>
chip_gen: v6e
topology: v6e:2x2x1
jax: 0.10.0
libtpu: 0.0.40
codegen_flags: <defaults>
</compile_context>

<pallas_src>
import functools

import jax
import jax.numpy as jnp
import numpy as np
from jax.experimental import pallas as pl
from jax.experimental.pallas import tpu as pltpu

_MIB = 1024 * 1024
_TEMP_F32_ARRAYS = 6   # conservative bound on simultaneously-live (tile_n, C) f32 temporaries


def _poly1_ce_kernel(*refs, epsilon, n_rows, tile_n, steps_per_core,
                     has_weight, index_labels):
    if has_weight:
        logits_ref, labels_ref, weight_ref, out_ref, acc_ref = refs
    else:
        logits_ref, labels_ref, out_ref, acc_ref = refs
        weight_ref = None

    c = pl.program_id(0)          # core slice of the row range (parallel axis)
    i = pl.program_id(1)          # step within this core's slice (reduction axis)

    @pl.when(i == 0)
    def _():
        acc_ref[...] = jnp.zeros_like(acc_ref)

    x = logits_ref[...].astype(jnp.float32)             # (tN, C)

    # Numerically-stable softmax pieces along the class (lane) axis; softmax / log_softmax
    # are never materialized as standalone (tN, C) temporaries.
    m = jnp.max(x, axis=-1, keepdims=True)               # (tN, 1)
    xm = x - m                                            # (tN, C)
    e = jnp.exp(xm)                                       # (tN, C)
    s = jnp.sum(e, axis=-1, keepdims=True)                # (tN, 1)
    nls = jnp.log(s) - xm                                 # -log_softmax, (tN, C)

    if index_labels:
        # One-hot fast path: build the label mask in-register; no [N, C] labels read from HBM.
        idx = labels_ref[...]                                        # (tN, 1) int32
        cls = jax.lax.broadcasted_iota(jnp.int32, x.shape, 1)        # (tN, C)
        onehot = cls == idx                                          # (tN, C) bool
        pt_num = jnp.sum(jnp.where(onehot, e, 0.0), axis=-1, keepdims=True)
        if has_weight:
            w = weight_ref[...].astype(jnp.float32)                  # (1, C)
            ce = jnp.sum(jnp.where(onehot, w * nls, 0.0), axis=-1, keepdims=True)
        else:
            ce = jnp.sum(jnp.where(onehot, nls, 0.0), axis=-1, keepdims=True)
    else:
        y = labels_ref[...].astype(jnp.float32)                      # (tN, C)
        pt_num = jnp.sum(y * e, axis=-1, keepdims=True)
        wy = weight_ref[...].astype(jnp.float32) * y if has_weight else y
        # Single fused lane reduction: sum(wy * (log s - (x - m))) == -sum(wy * log_softmax).
        ce = jnp.sum(wy * nls, axis=-1, keepdims=True)               # (tN, 1)

    pt = pt_num / s                                                  # (tN, 1), exact divide
    poly1 = ce + epsilon * (1.0 - pt)                                # (tN, 1)

    # Mask rows past the end of the array (ragged last tile / over-provisioned core slice).
    row = jax.lax.broadcasted_iota(jnp.int32, poly1.shape, 0)
    valid = n_rows - (c * steps_per_core + i) * tile_n
    poly1 = jnp.where(row < valid, poly1, 0.0)

    # Tiny per-core accumulator: reduce to (1, 1) every step, finalize once on the last step.
    acc_ref[...] += jnp.sum(poly1, axis=0, keepdims=True)

    @pl.when(i == pl.num_programs(1) - 1)
    def _():
        out_ref[...] = jnp.broadcast_to(acc_ref[...].reshape(1, 1, 1), out_ref.shape)


def _vmem_budgets():
    """Generation-aware (working-set budget, vmem_limit_bytes, target input-DMA bytes per step)."""
    cap = None
    try:
        cap = int(getattr(pltpu.get_tpu_info(), "vmem_capacity_bytes", 0)) or None
    except Exception:
        cap = None
    if cap is None:
        cap = 64 * _MIB                        # conservative: assume v7x-sized VMEM
    if cap >= 96 * _MIB:                       # v5e / v6e: 128 MiB physical per TensorCore
        return 80 * _MIB, 100 * _MIB, 16 * _MIB
    return 36 * _MIB, 48 * _MIB, 8 * _MIB      # v7x: 64 MiB physical per TensorCore


def _sublane_align(itemsize):
    return {4: 8, 2: 16, 1: 32}.get(int(itemsize), 8)


def _pick_tile_n(n, c, in_bytes_per_row, align, working_budget, target_step_bytes):
    """Largest row tile whose VMEM working set (2x double-buffered inputs plus live f32
    temporaries) fits the budget, targeting ~target_step_bytes of input DMA per grid step."""
    work_per_row = 2 * in_bytes_per_row + _TEMP_F32_ARRAYS * 4 * c
    t_budget = working_budget // max(work_per_row, 1)
    t_target = target_step_bytes // max(in_bytes_per_row, 1)
    t = min(t_budget, t_target)
    t = max(align, (t // align) * align)
    n_up = ((n + align - 1) // align) * align          # never tile bigger than (padded) N
    return int(min(t, n_up))


def poly1_cross_entropy_loss(logits, labels, *, epsilon=1.0, reduction="mean",
                             weight=None, tile_n=None, num_cores=2):
    """Pallas TPU implementation of Poly1CrossEntropyLoss.forward.

    logits: [N, C] float (f32 or bf16).
    labels: [N, C] float soft/one-hot targets, or [N] / [N, 1] integer class indices (fast path).
    weight: optional [C] per-class rescaling (as passed to F.cross_entropy).
    Returns a scalar. Note: 'mean' divides by N even when class weights are given -- this matches
    the PyTorch module (F.cross_entropy(reduction='none') followed by a plain .mean()), not
    F.cross_entropy(weight=..., reduction='mean').
    num_cores: row-range split for the "parallel" grid axis (2 uses both v7x TensorCores;
    on single-TensorCore v5e/v6e it is just a harmless sequential 2-way split).
    """
    N, C = logits.shape
    if reduction not in ("mean", "sum"):
        # TODO(synk): reduction='none' (per-row loss vector output) not implemented in-kernel.
        raise NotImplementedError("reduction must be 'mean' or 'sum'")

    labels = jnp.asarray(labels)
    index_labels = bool(jnp.issubdtype(labels.dtype, jnp.integer))
    if index_labels:
        assert labels.shape in ((N,), (N, 1)), "integer labels must be [N] or [N, 1]"
        labels_in = labels.reshape(N, 1).astype(jnp.int32)
        lab_bytes_per_row = 4
    else:
        assert labels.shape == (N, C), "dense labels must be [N, num_classes]"
        labels_in = labels
        lab_bytes_per_row = jnp.dtype(labels_in.dtype).itemsize * C

    has_weight = weight is not None

    in_bytes_per_row = jnp.dtype(logits.dtype).itemsize * C + lab_bytes_per_row
    align = _sublane_align(jnp.dtype(logits.dtype).itemsize)
    if not index_labels:
        align = max(align, _sublane_align(jnp.dtype(labels_in.dtype).itemsize))

    working_budget, vmem_limit, target_step = _vmem_budgets()
    if tile_n is None:
        tile_n = _pick_tile_n(N, C, in_bytes_per_row, align, working_budget, target_step)

    num_tiles = max(1, -(-N // tile_n))
    num_cores_eff = max(1, min(int(num_cores), num_tiles))
    steps_per_core = -(-num_tiles // num_cores_eff)
    grid = (num_cores_eff, steps_per_core)

    def tile_index(c_, i_):
        # Clamp so over-provisioned (core, step) pairs re-read the last valid tile; their rows
        # are fully masked inside the kernel.
        return (jnp.minimum(c_ * steps_per_core + i_, num_tiles - 1), 0)

    inputs = [logits, labels_in]
    in_specs = [
        pl.BlockSpec((tile_n, C), tile_index),                                  # logits tile
        pl.BlockSpec((tile_n, 1) if index_labels else (tile_n, C), tile_index),  # labels tile
    ]
    if has_weight:
        w = jnp.asarray(weight, jnp.float32).reshape(1, C)
        inputs.append(w)
        in_specs.append(pl.BlockSpec((1, C), lambda c_, i_: (0, 0)))  # resident class weights

    kernel = functools.partial(
        _poly1_ce_kernel, epsilon=float(epsilon), n_rows=N, tile_n=tile_n,
        steps_per_core=steps_per_core, has_weight=has_weight, index_labels=index_labels)

    out = pl.pallas_call(
        kernel,
        # One lane-dense (8, 128) partial per core; summed (and mean-scaled) in the wrapper.
        out_shape=jax.ShapeDtypeStruct((num_cores_eff, 8, 128), jnp.float32),
        grid_spec=pltpu.PrefetchScalarGridSpec(
            num_scalar_prefetch=0,
            grid=grid,
            in_specs=in_specs,
            out_specs=pl.BlockSpec((1, 8, 128), lambda c_, i_: (c_, 0, 0)),
            scratch_shapes=[pltpu.VMEM((1, 1), jnp.float32)],   # tiny per-core accumulator
        ),
        compiler_params=pltpu.CompilerParams(
            dimension_semantics=("parallel", "arbitrary"),
            vmem_limit_bytes=vmem_limit,
        ),
    )(*inputs)

    total = jnp.sum(out[:, 0, 0])
    if reduction == "mean":
        total = total / float(N)
    return total


class Poly1CrossEntropyLoss:
    """Thin module-style wrapper matching the PyTorch class."""

    def __init__(self, num_classes, epsilon=1.0, reduction="mean", weight=None):
        self.num_classes = num_classes
        self.epsilon = epsilon
        self.reduction = reduction
        self.weight = weight

    def __call__(self, logits, labels):
        return poly1_cross_entropy_loss(logits, labels, epsilon=self.epsilon,
                                        reduction=self.reduction, weight=self.weight)


def _reference(logits, labels, epsilon=1.0, weight=None, reduction="mean"):
    x = logits.astype(jnp.float32)
    C = x.shape[-1]
    labels = jnp.asarray(labels)
    if jnp.issubdtype(labels.dtype, jnp.integer):
        y = jax.nn.one_hot(labels.reshape(-1), C, dtype=jnp.float32)
    else:
        y = labels.astype(jnp.float32)
    w = jnp.ones((C,), jnp.float32) if weight is None else jnp.asarray(weight, jnp.float32)
    lse = jax.scipy.special.logsumexp(x, axis=-1, keepdims=True)
    log_sm = x - lse
    sm = jnp.exp(log_sm)
    ce = -jnp.sum(w[None, :] * y * log_sm, axis=-1)
    pt = jnp.sum(y * sm, axis=-1)
    poly1 = ce + epsilon * (1.0 - pt)
    return jnp.mean(poly1) if reduction == "mean" else jnp.sum(poly1)


if __name__ == "__main__":
    key = jax.random.PRNGKey(0)
    k1, k2, k3, k4 = jax.random.split(key, 4)

    N, C = 37, 128                      # small, lane-dense class axis; N ragged w.r.t. tile
    logits = jax.random.normal(k1, (N, C), dtype=jnp.float32)
    cls = jax.random.randint(k2, (N,), 0, C)
    onehot = jax.nn.one_hot(cls, C, dtype=jnp.float32)
    soft = jax.nn.softmax(jax.random.normal(k4, (N, C), dtype=jnp.float32), axis=-1)
    weight = jax.random.uniform(k3, (C,), minval=0.5, maxval=1.5, dtype=jnp.float32)

    # 1: dense one-hot labels, unweighted mean, small explicit tile -> multi-step 2-core grid,
    #    ragged last tile, over-provisioned core slice fully masked.
    loss1 = jax.block_until_ready(
        poly1_cross_entropy_loss(logits, onehot, epsilon=1.0, reduction="mean", tile_n=8))
    ref1 = _reference(logits, onehot, 1.0, None, "mean")
    np.testing.assert_allclose(np.asarray(loss1), np.asarray(ref1), rtol=1e-5, atol=1e-5)

    # 2: dense soft labels, weighted sum, auto-sized tile (single big block).
    loss2 = jax.block_until_ready(
        poly1_cross_entropy_loss(logits, soft, epsilon=2.0, reduction="sum", weight=weight))
    ref2 = _reference(logits, soft, 2.0, weight, "sum")
    np.testing.assert_allclose(np.asarray(loss2), np.asarray(ref2), rtol=1e-5, atol=1e-5)

    # 3: integer class-index labels (one-hot fast path), unweighted mean, multi-tile grid.
    loss3 = jax.block_until_ready(
        poly1_cross_entropy_loss(logits, cls, epsilon=1.0, reduction="mean", tile_n=8))
    ref3 = _reference(logits, cls, 1.0, None, "mean")
    np.testing.assert_allclose(np.asarray(loss3), np.asarray(ref3), rtol=1e-5, atol=1e-5)

    # 4: integer labels + class weights, sum, auto-sized tile.
    loss4 = jax.block_until_ready(
        poly1_cross_entropy_loss(logits, cls, epsilon=0.5, reduction="sum", weight=weight))
    ref4 = _reference(logits, cls, 0.5, weight, "sum")
    np.testing.assert_allclose(np.asarray(loss4), np.asarray(ref4), rtol=1e-5, atol=1e-5)

    print("KERNEL_OK")
</pallas_src>

<mosaic_0001>
module attributes {stable_mosaic.version = 11 : i64} {
  func.func @_poly1_ce_kernel(%arg0: i32, %arg1: i32, %arg2: memref<8x128xf32, #tpu.memory_space<vmem>>, %arg3: memref<8x128xf32, #tpu.memory_space<vmem>>, %arg4: memref<1x8x128xf32, #tpu.memory_space<vmem>>, %arg5: memref<1x1xf32, #tpu.memory_space<vmem>>) attributes {dimension_semantics = [#tpu.dimension_semantics<parallel>, #tpu.dimension_semantics<arbitrary>], iteration_bounds = array<i64: 2, 3>, scalar_prefetch = 0 : i64, scratch_operands = 1 : i64, tpu.core_type = #tpu.core_type<tc>, window_params = [{transform_indices = @transform_0, window_bounds = array<i64: 8, 128>}, {transform_indices = @transform_1, window_bounds = array<i64: 8, 128>}, {transform_indices = @transform_2, window_bounds = array<i64: 1, 8, 128>}]} {
    %c0_i32 = arith.constant 0 : i32
    %0 = arith.cmpi eq, %arg1, %c0_i32 : i32
    %1 = arith.extui %0 : i1 to i32
    %c0_i32_0 = arith.constant 0 : i32
    %2 = arith.cmpi ne, %1, %c0_i32_0 : i32
    scf.if %2 {
      %cst_16 = arith.constant 0.000000e+00 : f32
      %44 = vector.broadcast %cst_16 : f32 to vector<1x1xf32>
      %c0_17 = arith.constant 0 : index
      %c0_18 = arith.constant 0 : index
      %45 = vector.load %arg5[%c0_17, %c0_18] : memref<1x1xf32, #tpu.memory_space<vmem>>, vector<1x1xf32>
      tpu.vector_store %arg5[%c0_17, %c0_18], %44 {strides = array<i32>} : memref<1x1xf32, #tpu.memory_space<vmem>>, vector<1x1xf32>,
    } else {
    }
    %c0 = arith.constant 0 : index
    %c0_1 = arith.constant 0 : index
    %3 = vector.load %arg2[%c0, %c0_1] : memref<8x128xf32, #tpu.memory_space<vmem>>, vector<8x128xf32>
    %cst = arith.constant dense<0xFF800000> : vector<8xf32>
    %4 = vector.multi_reduction <maximumf>, %3, %cst [1] : vector<8x128xf32> to vector<8xf32>
    %5 = vector.shape_cast %4 : vector<8xf32> to vector<8x1xf32>
    %6 = vector.broadcast %5 : vector<8x1xf32> to vector<8x128xf32>
    %7 = arith.subf %3, %6 : vector<8x128xf32>
    %8 = math.exp %7 : vector<8x128xf32>
    %cst_2 = arith.constant dense<0.000000e+00> : vector<8xf32>
    %9 = vector.multi_reduction <add>, %8, %cst_2 [1] : vector<8x128xf32> to vector<8xf32>
    %10 = vector.shape_cast %9 : vector<8xf32> to vector<8x1xf32>
    %11 = math.log %10 : vector<8x1xf32>
    %12 = vector.broadcast %11 : vector<8x1xf32> to vector<8x128xf32>
    %13 = arith.subf %12, %7 : vector<8x128xf32>
    %c0_3 = arith.constant 0 : index
    %c0_4 = arith.constant 0 : index
    %14 = vector.load %arg3[%c0_3, %c0_4] : memref<8x128xf32, #tpu.memory_space<vmem>>, vector<8x128xf32>
    %15 = arith.mulf %14, %8 : vector<8x128xf32>
    %cst_5 = arith.constant dense<0.000000e+00> : vector<8xf32>
    %16 = vector.multi_reduction <add>, %15, %cst_5 [1] : vector<8x128xf32> to vector<8xf32>
    %17 = vector.shape_cast %16 : vector<8xf32> to vector<8x1xf32>
    %18 = arith.mulf %14, %13 : vector<8x128xf32>
    %cst_6 = arith.constant dense<0.000000e+00> : vector<8xf32>
    %19 = vector.multi_reduction <add>, %18, %cst_6 [1] : vector<8x128xf32> to vector<8xf32>
    %20 = vector.shape_cast %19 : vector<8xf32> to vector<8x1xf32>
    %21 = arith.divf %17, %10 : vector<8x1xf32>
    %cst_7 = arith.constant 1.000000e+00 : f32
    %22 = vector.broadcast %cst_7 : f32 to vector<8x1xf32>
    %23 = arith.subf %22, %21 : vector<8x1xf32>
    %cst_8 = arith.constant 1.000000e+00 : f32
    %24 = vector.broadcast %cst_8 : f32 to vector<8x1xf32>
    %25 = arith.mulf %24, %23 : vector<8x1xf32>
    %26 = arith.addf %20, %25 : vector<8x1xf32>
    %27 = tpu.iota {dimensions = array<i32: 0>} : vector<8x1xi32>
    %c3_i32 = arith.constant 3 : i32
    %28 = arith.muli %arg0, %c3_i32 : i32
    %29 = arith.addi %28, %arg1 : i32
    %c8_i32 = arith.constant 8 : i32
    %30 = arith.muli %29, %c8_i32 : i32
    %c37_i32 = arith.constant 37 : i32
    %31 = arith.subi %c37_i32, %30 : i32
    %32 = vector.broadcast %31 : i32 to vector<8x1xi32>
    %33 = arith.cmpi slt, %27, %32 : vector<8x1xi32>
    %cst_9 = arith.constant 0.000000e+00 : f32
    %34 = vector.broadcast %cst_9 : f32 to vector<8x1xf32>
    %35 = arith.select %33, %26, %34 : vector<8x1xi1>, vector<8x1xf32>
    %c0_10 = arith.constant 0 : index
    %c0_11 = arith.constant 0 : index
    %36 = vector.load %arg5[%c0_10, %c0_11] : memref<1x1xf32, #tpu.memory_space<vmem>>, vector<1x1xf32>
    %cst_12 = arith.constant dense<0.000000e+00> : vector<1xf32>
    %37 = vector.multi_reduction <add>, %35, %cst_12 [0] : vector<8x1xf32> to vector<1xf32>
    %38 = vector.shape_cast %37 : vector<1xf32> to vector<1x1xf32>
    %39 = arith.addf %36, %38 : vector<1x1xf32>
    %c0_13 = arith.constant 0 : index
    %c0_14 = arith.constant 0 : index
    %40 = vector.load %arg5[%c0_13, %c0_14] : memref<1x1xf32, #tpu.memory_space<vmem>>, vector<1x1xf32>
    tpu.vector_store %arg5[%c0_13, %c0_14], %39 {strides = array<i32>} : memref<1x1xf32, #tpu.memory_space<vmem>>, vector<1x1xf32>,
    %c2_i32 = arith.constant 2 : i32
    %41 = arith.cmpi eq, %arg1, %c2_i32 : i32
    %42 = arith.extui %41 : i1 to i32
    %c0_i32_15 = arith.constant 0 : i32
    %43 = arith.cmpi ne, %42, %c0_i32_15 : i32
    scf.if %43 {
      %c0_16 = arith.constant 0 : index
      %c0_17 = arith.constant 0 : index
      %44 = vector.load %arg5[%c0_16, %c0_17] : memref<1x1xf32, #tpu.memory_space<vmem>>, vector<1x1xf32>
      %45 = vector.shape_cast %44 : vector<1x1xf32> to vector<1x1x1xf32>
      %46 = vector.shape_cast %45 : vector<1x1x1xf32> to vector<1x1x1xf32>
      %47 = vector.broadcast %46 : vector<1x1x1xf32> to vector<1x8x128xf32>
      %c0_18 = arith.constant 0 : index
      %c0_19 = arith.constant 0 : index
      %c0_20 = arith.constant 0 : index
      %48 = vector.load %arg4[%c0_18, %c0_19, %c0_20] : memref<1x8x128xf32, #tpu.memory_space<vmem>>, vector<1x8x128xf32>
      tpu.vector_store %arg4[%c0_18, %c0_19, %c0_20], %47 {strides = array<i32>} : memref<1x8x128xf32, #tpu.memory_space<vmem>>, vector<1x8x128xf32>,
    } else {
    }
    return
  }
  func.func @transform_0(%arg0: i32, %arg1: i32) -> (i32, i32) {
    %c3_i32 = arith.constant 3 : i32
    %0 = arith.muli %arg0, %c3_i32 : i32
    %1 = arith.addi %0, %arg1 : i32
    %c4_i32 = arith.constant 4 : i32
    %2 = arith.minsi %1, %c4_i32 : i32
    %c0_i32 = arith.constant 0 : i32
    %c0_i32_0 = arith.constant 0 : i32
    return %2, %c0_i32 : i32, i32
  }
  func.func @transform_1(%arg0: i32, %arg1: i32) -> (i32, i32) {
    %c3_i32 = arith.constant 3 : i32
    %0 = arith.muli %arg0, %c3_i32 : i32
    %1 = arith.addi %0, %arg1 : i32
    %c4_i32 = arith.constant 4 : i32
    %2 = arith.minsi %1, %c4_i32 : i32
    %c0_i32 = arith.constant 0 : i32
    %c0_i32_0 = arith.constant 0 : i32
    return %2, %c0_i32 : i32, i32
  }
  func.func @transform_2(%arg0: i32, %arg1: i32) -> (i32, i32, i32) {
    %c0_i32 = arith.constant 0 : i32
    %c0_i32_0 = arith.constant 0 : i32
    %c0_i32_1 = arith.constant 0 : i32
    return %arg0, %c0_i32, %c0_i32_0 : i32, i32, i32
  }
}

</mosaic_0001>

<bundles_post_ra>
// kernel: tpu_custom_call.1
= control target key start
LH: loop header
LB: loop body
LE: loop exit
PB: predicated region body
PF: predicated region fallthrough
CT: control target
= control target key end

     0   :  { %s990_s0 = inlined_call_operand.hbm [shape: f32[37,128], index: 0, kind: input, shape index: {}]   ;;  %s991_s1 = inlined_call_operand.hbm [shape: f32[37,128], index: 1, kind: input, shape index: {}]   ;;  %s992_s2 = inlined_call_operand.hbm [shape: f32[2,8,128], index: 2, kind: output, shape index: {}]  }
   0x1   :  { %996 = sst [smem:[#allocation15_spill]] %s990_s0 }
   0x2   :  { %7 = vsyncpa [#allocation4], 0 }
   0x3   :  { %9 = vsyncpa [#allocation4 + $0x1], 0 }
   0x4   :  { %10 = vsyncpa [#allocation7], 0 }
   0x5   :  { %12 = vsyncpa [#allocation7 + $0x1], 0 }
   0x6   :  { %13 = vsyncpa [#allocation5], 0 }
   0x7   :  { %15 = vsyncpa [#allocation5 + $0x1], 0  ;;  %s758_s9 = smov 0   ;;  %s760_s10 = smov 0  }
   0x8   :  { %s762_s11 = smov 0   ;;  %s764_s12 = smov 0  }
   0x9   :  { %s766_s13 = smov 0   ;;  %s768_s14 = smov 0  }
   0xa   :  { %s770_s15 = smov 0   ;;  %s772_s16 = smov 0  }
   0xb   :  { %s774_s17 = smov 0   ;;  %s776_s18 = smov 0  }
   0xc   :  { %s778_s19 = smov 0  }
   0xd LB: > { %997 = sst [smem:[#allocation12_spill]] %s732_s18  ;;  %s420_s20 = sadd.s32 4294967295, %s736_s19   ;;  %s736_s19 = sphi %s778_s19, %s21_s19   ;;  %s732_s18 = sphi %s776_s18, %s1009_s18   ;;  %s728_s17 = sphi %s774_s17, %s1017_s17   ;;  %s724_s16 = sphi %s772_s16, %s1007_s16   ;;  %s720_s15 = sphi %s770_s15, %s1016_s15   ;;  %s716_s14 = sphi %s768_s14, %s1015_s14   ;;  %s712_s13 = sphi %s766_s13, %s1014_s13   ;;  %s708_s12 = sphi %s764_s12, %s1013_s12   ;;  %s704_s11 = sphi %s762_s11, %s1012_s11   ;;  %s700_s10 = sphi %s760_s10, %s1011_s10   ;;  %s696_s9 = sphi %s758_s9, %s1010_s9  }
   0xe   : > { %s421_s21 = sadd.s32 4294967294, %s736_s19   ;;  %s30_s22 = sadd.s32 1, %s728_s17 }
   0xf   : > { %s33_s23 = sadd.s32 1, %s732_s18  ;;  %p31_p0 = scmp.ge.s32.totalorder %s30_s22, 3 }
  0x10   : > { %s37_s24 = smul.u32 3, %s732_s18  ;;  %s48_s25 = sadd.s32 1, %s716_s14 }
  0x11   : > { %p55_p1 = scmp.ne.s32.totalorder %s716_s14, %s712_s13  ;;  %s1019_s22 = smov (%p31_p0, %s30_s22), 0 }
  0x12   : > { %998 = sst [smem:[#allocation13_spill]] %s1019_s22  ;;  %s1021_s23 = smov (!%p31_p0, %s33_s23), %s732_s18 }
  0x13   : > { %s38_s26 = sadd.s32 %s728_s17, %s37_s24  ;;  %p56_p2 = scmp.eq.s32.totalorder %s736_s19, 0 }
  0x14   : > { %p35_p3 = scmp.ge.s32.totalorder %s1021_s23, 2  ;;  %p39_p4 = scmp.lt.s32.totalorder %s38_s26, 4 }
  0x15   : > { %p826_p5 = por %p56_p2, %p55_p1  ;;  %p61_p6 = scmp.ne.s32.totalorder %s712_s13, %s708_s12 }
  0x16   : > { %s1023_s23 = smov (%p35_p3, %s1021_s23), 0  ;;  %s1025_s26 = smov (!%p39_p4, %s38_s26), 4 }
  0x17   : > { %1000 = sst [smem:[#allocation14_spill]] %s1023_s23  ;;  %s41_s28 = smul.u32 3, %s1023_s23 }
  0x18   : > { %p62_p7 = scmp.eq.s32.totalorder %s420_s20, 0  ;;  %s105_s29 = ssub.s32 %s732_s18, %s1023_s23 }
  0x19   : > { %s108_s30 = sadd.s32 1, %s704_s11  ;;  %s42_s3 = sadd.s32 %s41_s28, %s1019_s22 }
  0x1a   : > { %p841_p8 = por %p62_p7, %p61_p6  ;;  %p43_p9 = scmp.lt.s32.totalorder %s42_s3, 4 }
  0x1b   : > { %p106_p10 = scmp.eq.s32.totalorder %s105_s29, 0  ;;  %p118_p11 = scmp.ne.s32.totalorder %s704_s11, %s700_s10 }
  0x1c   : > { %p119_p12 = scmp.eq.s32.totalorder %s420_s20, 5  ;;  %s1027_s3 = smov (!%p43_p9, %s42_s3), 4 }
  0x1d   : > { %s848_s5 = scalar_select %p106_p10, %s704_s11, %s108_s30  }
  0x1e   : > { %s45_s6 = ssub.s32 %s1025_s26, %s1027_s3  ;;  %p851_p13 = por %p119_p12, %p118_p11 }
  0x1f   : > { %p46_p0 = scmp.eq.s32.totalorder %s45_s6, 0  ;;  %p124_p1 = scmp.ne.s32.totalorder %s700_s10, %s696_s9 }
  0x20   : > { %p125_p2 = scmp.eq.s32.totalorder %s421_s21, 5  ;;  %p457_p4 = scmp.lt.s32.totalorder %s736_s19, 6 }
  0x21   : > { %s862_s8 = scalar_select %p46_p0, %s716_s14, %s48_s25  }
  0x22   : > { %p864_p3 = por %p125_p2, %p124_p1  ;;  %s870_s20 = sand.u32 1, %s716_s14  }
  0x23   : > { %s425_s24 = sshll.u32 %s1025_s26, 7  ;;  %s424_s28 = sshll.u32 %s870_s20, 3 }
  0x24   : > { %s1004_s0 = sld [smem:[#allocation15_spill]]  ;;  %s149_s6 = scalar_lea.vmem [#allocation3], %s424_s28 }
  0x25   : > { %s160_s21 = sshll.u32 %s149_s6, 4  ;;  %p879_p6 = pnand %p457_p4, %p826_p5  ;;  %s161_s21 = int_to_ptr.vmem [resolvable:$true] %s160_s21 }
  0x26   : > { %p428_p7 = scmp.ge.s32.totalorder %s736_s19, 1  ;;  %p187_p9 = scmp.lt.s32.totalorder %s736_s19, 7 }
  0x27   : > { %s146_s23 = scalar_lea.sflag [#allocation4], %s870_s20  ;;  %p558_p10 = pneg %p879_p6 }
  0x28   : > { %s569_s26 = scalar_lea.vmem %s161_s21, 128  ;;  %s738_s29 = smov [#allocation3]  }
  0x29   : > { %p570_p11 = scmp.ne.s32.totalorder %s161_s21, %s569_s26  ;;  %s574_s27 = sshll.u32 %s738_s29, 4  ;;  %s575_s27 = int_to_ptr.vmem [resolvable:$false] %s574_s27 }
  0x2a   : > { %s158_s3 = scalar_lea.hbm %s1004_s0, %s425_s24  ;;  %s576_s30 = scalar_lea.vmem %s575_s27, 256 }
  0x2b   : > { %p572_p12 = pnand %p570_p11, %p558_p10  ;;  %p577_p5 = scmp.lt.s32.totalorder %s161_s21, %s575_s27 }
  0x2c   : > { %p578_p1 = scmp.lt.s32.totalorder %s576_s30, %s569_s26 }
  0x2d   : > { %p573_p0 = pneg %p572_p12 }
  0x2e   : > { %p579_p2 = por %p578_p1, %p577_p5 }
  0x30   : > { %p580_p4 = pnand %p579_p2, %p573_p0 }
  0x32   : > { %583 = shalt.err (!%p580_p4)
}
  0x33   : > { %449 = dma.hbm_to_vmem [thread:$0]  (!%p879_p6), %s158_s3, 128, %s161_s21, %s146_s23  }
  0x34   : > { %p897_p11 = pnand %p428_p7, %p187_p9  ;;  %s180_s26 = scalar_lea.hbm %s991_s1, %s425_s24 }
  0x35   : > { %s171_s27 = scalar_lea.vmem [#allocation6], %s424_s28  ;;  %s168_s22 = scalar_lea.sflag [#allocation7], %s870_s20 }
  0x36   : > { %s182_s30 = sshll.u32 %s171_s27, 4  ;;  %s739_s23 = smov [#allocation6]   ;;  %s183_s30 = int_to_ptr.vmem [resolvable:$true] %s182_s30 }
  0x37   : > { %s597_s18 = scalar_lea.vmem %s183_s30, 128  ;;  %s602_s3 = sshll.u32 %s739_s23, 4  ;;  %s603_s3 = int_to_ptr.vmem [resolvable:$false] %s602_s3 }
  0x38   : > { %p598_p12 = scmp.ne.s32.totalorder %s183_s30, %s597_s18  ;;  %s604_s21 = scalar_lea.vmem %s603_s3, 256 }
  0x39   : > { %p605_p7 = scmp.lt.s32.totalorder %s183_s30, %s603_s3  ;;  %p606_p9 = scmp.lt.s32.totalorder %s604_s21, %s597_s18 }
  0x3a   : > { %p600_p0 = pnand %p598_p12, %p558_p10 }
  0x3b   : > { %p607_p1 = por %p606_p9, %p605_p7 }
  0x3c   : > { %p601_p5 = pneg %p600_p0 }
  0x3e   : > { %p608_p2 = pnand %p607_p1, %p601_p5 }
  0x40   : > { %611 = shalt.err (!%p608_p2)
}
  0x41   : > { %452 = dma.hbm_to_vmem [thread:$0]  (!%p879_p6), %s180_s26, 128, %s183_s30, %s168_s22  }
  0x42   : > { %191 = sbr.rel (%p897_p11) target bundleno = 709 (0x2c5), region = 28  ;;  %s193_s0 = sand.u32 (!%p897_p11), 1, %s712_s13  }
  0x43   : > { %s429_s20 = sshll.u32 (!%p897_p11), %s193_s0, 3  ;;  %s194_s24 = scalar_lea.sflag (!%p897_p11), [#allocation4], %s193_s0 }
  0x44   : > { %s197_s28 = scalar_lea.vmem (!%p897_p11), [#allocation3], %s429_s20 }
  0x47   : > { %683 = dma.done.wait (%p841_p8), %s194_s24, 128  }
  0x48   : > { %685 = vsyncadd (%p841_p8), %s194_s24, 4294967168  ;;  %s203_s18 = scalar_lea.sflag [#allocation7], %s193_s0  ;;  %s206_s29 = scalar_lea.vmem [#allocation6], %s429_s20 }
  0x49   : > { %687 = dma.done.wait (%p841_p8), %s203_s18, 128  }
  0x4a   : > { %689 = vsyncadd (%p841_p8), %s203_s18, 4294967168  ;;  %s229_s22 = sand.u32 1, %s700_s10   ;;  %p432_p6 = scmp.ne.s32.totalorder %s720_s15, 0 }
  0x4b   : > { %s924_s25 = sshll.u32 %s229_s22, 3 }
  0x4c   : > { %s231_s6 = scalar_lea.vmem [#allocation8], %s924_s25  ;;  %243 = sbr.rel (%p432_p6) target bundleno = 83 (0x53), region = 40 }
  0x51   : > { %vm244_vm0 = vcmask 0   ;;  %v740_v0 = vmov 0.0  }
  0x52   : > { %245 = vst.msk [vmem:[#allocation2] sm:$0x1] %vm244_vm0, %v740_v0 }
  0x53 PF: > { %v246_v1 = vld [vmem:[%s197_s28] sm:$0xff]  ;;  %v257_v5 = vld [vmem:[%s206_s29] sm:$0xff]  ;;  %s270_s4 = smul.u32 3, %s724_s16  ;;  %v268_v14 = vlaneseq  ;;  %vm285_vm2 = vcmask 0   ;;  %p434_p8 = scmp.ne.s32.totalorder %s720_s15, 2 }
  0x54   : > { %247 = vmax.xlane.f32.xlu0 %v246_v1 }
  0x55   : > { %s271_s26 = sadd.s32 %s720_s15, %s270_s4  ;;  %v269_v17 = vshrl.u32 %v268_v14, 7 }
  0x56   : > { %s433_s27 = sshll.u32 %s271_s26, 3 }
  0x57   : > { %s273_s30 = ssub.s32 37, %s433_s27 }
  0x58   : > { %v274_v18 = vstv %s273_s30 }
  0x59   : > { %vm275_vm1 = vcmp.lt.s32.totalorder %v269_v17, %v274_v18  ;;  %v277_v28 = vld [vmem:[#allocation2] sm:$0x1] }
  0xdd   : > { %v248_v2 = vpop.xlane.xlu0 %247 }
  0xde   : > { %v249_v3 = vsub.f32 %v246_v1, %v248_v2 }
  0xe0   : > { %v250_v4 = vmul.f32 1.442695, %v249_v3 }
  0xe2   : > { %549 = vpow2.f32 %v250_v4 }
  0xef   : > { %v550_v6 = vpop.eup %549 }
  0xf0   : > { %252 = vadd.xlane.f32.xlu0 %v550_v6  ;;  %v258_v7 = vmul.f32 %v550_v6, %v257_v5 }
  0xf2   : > { %259 = vadd.xlane.f32.xlu1 %v258_v7 }
 0x179   : > { %v253_v8 = vpop.xlane.xlu0 %252 }
 0x17a   : > { %551 = vlog2.f32 %v253_v8 }
 0x17b   : > { %553 = vrcp.f32 %v253_v8  ;;  %v260_v15 = vpop.xlane.xlu1 %259 }
 0x187   : > { %v552_v9 = vpop.eup %551 }
 0x188   : > { %v255_v10 = vmul.f32 0.6931472, %v552_v9  ;;  %v554_v13 = vpop.eup %553 }
 0x189   : > { %v265_v16 = vmul.f32 %v554_v13, %v260_v15 }
 0x18a   : > { %v256_v11 = vsub.f32 %v255_v10, %v249_v3 }
 0x18b   : > { %v266_v19 = vsub.f32 1.0, %v265_v16 }
 0x18c   : > { %v261_v12 = vmul.f32 %v257_v5, %v256_v11 }
 0x18e   : > { %262 = vadd.xlane.f32.xlu1 %v261_v12 }
 0x217   : > { %v263_v20 = vpop.xlane.xlu1 %262 }
 0x218   : > { %v267_v21 = vadd.f32 %v266_v19, %v263_v20 }
 0x21a   : > { %v276_v22 = vsel %vm275_vm1, %v267_v21, 0.0 }
 0x21b   : > { %v278_v23 = vrot.slane %v276_v22, 4 }
 0x21d   : > { %v279_v24 = vadd.f32 %v278_v23, %v276_v22 }
 0x21f   : > { %v280_v25 = vrot.slane %v279_v24, 2 }
 0x221   : > { %v281_v26 = vadd.f32 %v280_v25, %v279_v24 }
 0x223   : > { %v282_v27 = vrot.slane %v281_v26, 1 }
 0x225   : > { %v283_v29 = vadd.f32 %v282_v27, %v281_v26  ;;  %290 = sbr.rel (%p434_p8) target bundleno = 686 (0x2ae), region = 44 }
 0x227   : > { %v284_v30 = vadd.f32 %v283_v29, %v277_v28 }
 0x229   : > { %286 = vst.msk [vmem:[#allocation2] sm:$0x1] %vm285_vm2, %v284_v30 }
 0x22a   : > { %v741_v32 = vmov 0  }
 0x22b   : > { %555 = vset.pattern.permute.xlu0 %v741_v32 }
 0x230   : > { %v435_v31 = vld [vmem:[#allocation2] ss:$0 sm:$0xff] }
 0x231   : > { %298 = vperm.xlu0 %555, %v435_v31  }
 0x2ac   : > { %v299_v33 = vpop.permute.xlu0 %298 }
 0x2ad   : > { %301 = vst [vmem:[%s231_s6] sm:$0xff] %v299_v33 }
 0x2ae PF: > { %s437_s23 = sshll.u32 %s724_s16, 7  ;;  %s316_s15 = sshll.u32 %s231_s6, 4  ;;  %s317_s15 = int_to_ptr.vmem [resolvable:$true] %s316_s15 }
 0x2af   : > { %s314_s0 = scalar_lea.hbm %s992_s2, %s437_s23  ;;  %s303_s20 = scalar_lea.sflag [#allocation5], %s229_s22 }
 0x2b0   : > { %s612_s24 = scalar_lea.vmem %s317_s15, 128  ;;  %s742_s28 = smov [#allocation8]  }
 0x2b1   : > { %p613_p10 = scmp.ne.s32.totalorder %s317_s15, %s612_s24  ;;  %s616_s18 = sshll.u32 %s742_s28, 4  ;;  %s617_s18 = int_to_ptr.vmem [resolvable:$false] %s616_s18 }
 0x2b2   : > { %s618_s29 = scalar_lea.vmem %s617_s18, 256  ;;  %p619_p12 = scmp.lt.s32.totalorder %s317_s15, %s617_s18 }
 0x2b3   : > { %p614_p4 = pnand %p613_p10, %p851_p13  ;;  %p620_p0 = scmp.lt.s32.totalorder %s618_s29, %s612_s24 }
 0x2b5   : > { %p615_p11 = pneg %p614_p4  ;;  %p621_p5 = por %p620_p0, %p619_p12 }
 0x2b7   : > { %p622_p7 = pnand %p621_p5, %p615_p11 }
 0x2b9   : > { %625 = shalt.err (!%p622_p7)
}
 0x2ba   : > { %s626_s16 = scalar_lea.hbm %s314_s0, 128  ;;  %s630_s6 = scalar_lea.hbm %s992_s2, 256 }
 0x2bb   : > { %p627_p9 = scmp.ne.s32.totalorder %s314_s0, %s626_s16  ;;  %p631_p6 = scmp.lt.s32.totalorder %s314_s0, %s992_s2 }
 0x2bc   : > { %p632_p8 = scmp.lt.s32.totalorder %s630_s6, %s626_s16 }
 0x2bd   : > { %p628_p1 = pnand %p627_p9, %p851_p13 }
 0x2be   : > { %p633_p10 = por %p632_p8, %p631_p6 }
 0x2bf   : > { %p629_p2 = pneg %p628_p1 }
 0x2c1   : > { %p634_p4 = pnand %p633_p10, %p629_p2 }
 0x2c3   : > { %637 = shalt.err (!%p634_p4)
}
 0x2c4   : > { %444 = dma.vmem_to_hbm [thread:$0]  (%p851_p13), %s317_s15, 128, %s314_s0, %s303_s20  }
 0x2c5 PF: > { %p458_p11 = scmp.ge.s32.totalorder %s736_s19, 2  ;;  %s328_s27 = sand.u32 1, %s696_s9  }
 0x2c6   : > { %s329_s30 = scalar_lea.sflag [#allocation5], %s328_s27 }
 0x2c7   : > { %p454_p12 = pnand %p458_p11, %p864_p3 }
 0x2c9   : > { %p455_p0 = pneg %p454_p12 }
 0x2cb   : > { %691 = dma.done.wait (%p455_p0), %s329_s30, 128  }
 0x2cc   : > { %693 = vsyncadd (%p455_p0), %s329_s30, 4294967168  ;;  %s21_s19 = sadd.s32 1, %s736_s19   ;;  %s1007_s16 = sld [smem:[#allocation12_spill]] }
 0x2cd   : > { %p18_p5 = scmp.ge.s32.totalorder %s21_s19, 8   ;;  %s1008_s7 = sld [smem:[#allocation13_spill]] }
 0x2ce   : > { %s1009_s18 = sld [smem:[#allocation14_spill]]  ;;  %s1010_s9 = smov %s700_s10 }
 0x2cf   : > { %s1011_s10 = smov %s704_s11  ;;  %s1012_s11 = smov %s848_s5 }
 0x2d0   : > { %s1013_s12 = smov %s712_s13  ;;  %s1014_s13 = smov %s716_s14 }
 0x2d1   : > { %s1015_s14 = smov %s862_s8  ;;  %s1016_s15 = smov %s728_s17 }
 0x2d2   :  { %20 = sbr.rel (!%p18_p5) target bundleno = 13 (0xd), region = 94 }
 0x2d3   : > { %s1017_s17 = smov %s1008_s7 }
 0x2d7   :  { %334 = vsyncpa [#allocation4], 1 }
 0x2d8   :  { %336 = vsyncpa [#allocation4 + $0x1], 1 }
 0x2d9   :  { %337 = vsyncpa [#allocation7], 1 }
 0x2da   :  { %339 = vsyncpa [#allocation7 + $0x1], 1 }
 0x2db   :  { %340 = vsyncpa [#allocation5], 1 }
 0x2dc   :  { %342 = vsyncpa [#allocation5 + $0x1], 1 }

</bundles_post_ra>
